<compile_context>
chip_gen: v7x
topology: tpu7x:2x2x1
jax: 0.10.0
libtpu: 0.0.40
codegen_flags: <defaults>
</compile_context>

<pallas_src>
import numpy as np
import jax
import jax.numpy as jnp
from jax import lax
from jax.experimental import pallas as pl
from jax.experimental.pallas import tpu as pltpu

DEFAULT_LOGVAR = -33.0
LANE = 128      # f32 lane tile
SUBLANE = 8     # f32 sublane tile


def _sigmoid(x):
    # explicit form so the in-kernel and reference activations match exactly
    return 1.0 / (1.0 + jnp.exp(-x))


def _round_up(n, m):
    return ((n + m - 1) // m) * m


def _pad2(a, rows, cols):
    a = jnp.asarray(a, jnp.float32)
    return jnp.pad(a, ((0, rows - a.shape[0]), (0, cols - a.shape[1])))


# --------------------------------------------------------------------------
# Fused Pallas kernel: the entire network forward in one launch
# --------------------------------------------------------------------------
def _make_fused_kernel(meta, n_input, b_tile, feat_pad, k_pad):
    """meta: tuple of (layer_key, n_in, n_out, cols_to_cache, needed_cache_keys)
    in execution order (layer n_layers-1 first, layer 0 last). All static."""

    def kernel(x_ref, w_ref, b_ref, ew_ref, eb_ref, out_ref):
        x = x_ref[...]                                   # (b_tile, feat_pad) f32
        cache = {}
        cur_width = n_input
        # iota hoisted out of the layer loop (broadcast_in_dim is not CSE'd)
        lane = lax.broadcasted_iota(jnp.int32, (b_tile, feat_pad), 1)

        for pos, (layer_key, n_in, n_out, to_cache, needed) in enumerate(meta):
            # torch: self._cache[i, idx] = x.index_select(1, idx)
            for idx in to_cache:
                cache[(layer_key, idx)] = x[:, idx:idx + 1]
            # torch: x = torch.cat([x] + cached_needed, dim=1)
            # -> lane splice into the padded slab (data stays in VMEM/vregs)
            for j, key in enumerate(needed):
                x = jnp.where(lane == cur_width + j, cache[key], x)

            # (mu | sigma) stacked along the K axis: (2*k_pad, feat_pad)
            w_pack = w_ref[pos]
            w = w_pack[:k_pad] + w_pack[k_pad:] * ew_ref[pos]   # reparam sample
            b_pack = b_ref[pos]                                  # (2, feat_pad)
            b = b_pack[0:1, :] + b_pack[1:2, :] * eb_ref[pos]

            # x @ W with the contraction shrunk to k_pad lanes; padded K rows of
            # w are exact zeros, so the sigmoid(0)=0.5 padded lanes of x are
            # harmless.  Weights stored (in, out): lane-dense MXU output.
            x = jnp.dot(x[:, :k_pad], w,
                        preferred_element_type=jnp.float32) + b

            if layer_key > 0:                            # activation on all but last layer
                x = _sigmoid(x)
            cur_width = n_out

        out_ref[...] = x                                 # lane-dense padded slab

    return kernel


def build_fused_network(layers, n_input, batch):
    """Pack the genome-static parameters once and return a jitted forward()."""
    order = sorted(layers.keys(), reverse=True)          # execution order
    meta = []
    widths = [n_input]
    max_n_in = n_input
    for i in order:
        n_out, n_in = layers[i]["qw_mean"].shape
        widths += [n_in, n_out]
        max_n_in = max(max_n_in, n_in)
        meta.append((i, n_in, n_out,
                     tuple(layers[i]["indices_of_nodes_to_cache"]),
                     tuple(layers[i]["indices_of_needed_nodes"])))
    feat_pad = _round_up(max(widths), LANE)
    k_pad = _round_up(max_n_in, SUBLANE)                 # contraction padded to 8s only
    if batch <= LANE:
        b_tile = _round_up(max(batch, SUBLANE), SUBLANE)
    else:
        b_tile = LANE
    b_pad = _round_up(max(batch, b_tile), b_tile)
    n_out_final = meta[-1][2]
    n_layers = len(order)

    # ---- genome-static parameter packing + KL hoisting (host side, once) ----
    # fold masks, precompute sigma = exp(0.5*logvar), transpose to (in, out),
    # zero-pad K to k_pad (NOT 128), stack mu|sigma along K, stack layers.
    w_stack, b_stack = [], []
    kl_static = jnp.float32(0.0)
    for i in order:
        L = layers[i]
        w_mu = L["qw_mean"] * L["mask_mean"]
        w_lv = L["qw_logvar"] * L["mask_logvar_mul"] + L["mask_logvar_add"]
        b_mu = L["qb_mean"]
        b_lv = L["qb_logvar"]
        # closed-form KL(q || N(0,1)) over the genome-declared entries is fully
        # static -> computed here instead of inside the kernel.
        kl_static = kl_static + 0.5 * jnp.sum(jnp.exp(w_lv) + w_mu ** 2 - 1.0 - w_lv)
        kl_static = kl_static + 0.5 * jnp.sum(jnp.exp(b_lv) + b_mu ** 2 - 1.0 - b_lv)
        w_stack.append(jnp.concatenate(
            [_pad2(w_mu.T, k_pad, feat_pad),
             _pad2(jnp.exp(0.5 * w_lv).T, k_pad, feat_pad)], axis=0))
        b_stack.append(jnp.concatenate(
            [_pad2(b_mu, 1, feat_pad),
             _pad2(jnp.exp(0.5 * b_lv), 1, feat_pad)], axis=0))
    w_stack = jnp.stack(w_stack)                         # (L, 2*k_pad, feat_pad)
    b_stack = jnp.stack(b_stack)                         # (L, 2, feat_pad)

    kernel = _make_fused_kernel(tuple(meta), n_input, b_tile, feat_pad, k_pad)

    def _fixed(shape):
        nd = len(shape)
        return pl.BlockSpec(shape, lambda i, _nd=nd: (0,) * _nd)

    # Tiny network: weights/bias/eps are VMEM-resident for every batch tile
    # (a few tens of KiB, far below any VMEM budget).  Batch tiles are
    # independent -> "parallel" so v7x's 2 TensorCores can split larger batches
    # or stacked MC samples; this is where launch cost is amortized.
    call = pl.pallas_call(
        kernel,
        out_shape=jax.ShapeDtypeStruct((b_pad, feat_pad), jnp.float32),
        grid=(b_pad // b_tile,),
        in_specs=[pl.BlockSpec((b_tile, feat_pad), lambda i: (i, 0)),
                  _fixed(tuple(w_stack.shape)),
                  _fixed(tuple(b_stack.shape)),
                  _fixed((n_layers, k_pad, feat_pad)),
                  _fixed((n_layers, 1, feat_pad))],
        out_specs=pl.BlockSpec((b_tile, feat_pad), lambda i: (i, 0)),
        compiler_params=pltpu.CompilerParams(
            dimension_semantics=("parallel",)),
    )

    @jax.jit
    def forward(x, eps_w_stack, eps_b_stack):
        x_pad = _pad2(x.astype(jnp.float32), b_pad, feat_pad)
        out_pad = call(x_pad, w_stack, b_stack, eps_w_stack, eps_b_stack)
        # KL is genome-static: returned as the precomputed constant.
        return out_pad[:batch, :n_out_final], kl_static

    def pack_eps(eps):
        ew = jnp.stack([_pad2(eps[i][0].T, k_pad, feat_pad) for i in order])
        eb = jnp.stack([_pad2(eps[i][1], 1, feat_pad) for i in order])
        return ew, eb

    return forward, pack_eps


# --------------------------------------------------------------------------
# Pure-JAX reference (mirrors ComplexStochasticNetwork.forward) for validation
# --------------------------------------------------------------------------
def ref_stochastic_linear(x, layer, eps_w, eps_b):
    w_mean = layer["qw_mean"] * layer["mask_mean"]
    w_logvar = layer["qw_logvar"] * layer["mask_logvar_mul"] + layer["mask_logvar_add"]
    b_mean = layer["qb_mean"]
    b_logvar = layer["qb_logvar"]
    w = w_mean + jnp.exp(0.5 * w_logvar) * eps_w
    b = b_mean + jnp.exp(0.5 * b_logvar) * eps_b
    y = jnp.dot(x, w.T, precision=lax.Precision.HIGHEST) + b
    kl = (0.5 * jnp.sum(jnp.exp(w_logvar) + w_mean ** 2 - 1.0 - w_logvar)
          + 0.5 * jnp.sum(jnp.exp(b_logvar) + b_mean ** 2 - 1.0 - b_logvar))
    return y, kl


def ref_network_forward(layers, x, eps):
    kl_qw_pw = jnp.float32(0.0)
    cache = {}
    for i in range(len(layers) - 1, -1, -1):
        layer = layers[i]
        for idx in layer["indices_of_nodes_to_cache"]:
            cache[(i, idx)] = x[:, idx:idx + 1]
        chunks = [x] + [cache[k] for k in layer["indices_of_needed_nodes"]]
        x = jnp.concatenate(chunks, axis=1)
        x, kl_layer = ref_stochastic_linear(x, layer, *eps[i])
        kl_qw_pw = kl_qw_pw + kl_layer
        if i > 0:
            x = _sigmoid(x)
    return x, kl_qw_pw


# --------------------------------------------------------------------------
# Deterministic synthetic genome -> layer parameters (what
# transform_genome_to_layers + generate_layer_masks would produce for a small
# 4 -> 8 -> 2 genome with one skip connection from input node #2 directly to
# the output layer, fix_std=False).
# --------------------------------------------------------------------------
def build_layers(key):
    n_input, n_hidden, n_output = 4, 8, 2
    k = jax.random.split(key, 4)

    # layer 1 (hidden layer, fully connected to the 4 genome inputs)
    layer1 = dict(
        qw_mean=0.5 * jax.random.normal(k[0], (n_hidden, n_input), jnp.float32),
        qw_logvar=jnp.full((n_hidden, n_input), -5.0, jnp.float32),
        qb_mean=0.1 * jax.random.normal(k[1], (1, n_hidden), jnp.float32),
        qb_logvar=jnp.full((1, n_hidden), -5.0, jnp.float32),
        mask_mean=jnp.ones((n_hidden, n_input), jnp.float32),
        mask_logvar_mul=jnp.ones((n_hidden, n_input), jnp.float32),
        mask_logvar_add=jnp.zeros((n_hidden, n_input), jnp.float32),
        indices_of_nodes_to_cache=[2],   # input column needed externally by layer 0
        indices_of_needed_nodes=[],
    )

    # layer 0 (output layer: 8 hidden outputs + 1 external cached input column)
    n_in0 = n_hidden + 1
    mask_mean0 = np.ones((n_output, n_in0), np.float32)
    mask_logvar_add0 = np.zeros((n_output, n_in0), np.float32)
    for (o, i_) in [(0, 3), (1, 7)]:     # connections absent from the genome
        mask_mean0[o, i_] = 0.0
        mask_logvar_add0[o, i_] = DEFAULT_LOGVAR
    layer0 = dict(
        qw_mean=0.5 * jax.random.normal(k[2], (n_output, n_in0), jnp.float32),
        qw_logvar=jnp.full((n_output, n_in0), -5.0, jnp.float32),
        qb_mean=0.1 * jax.random.normal(k[3], (1, n_output), jnp.float32),
        qb_logvar=jnp.full((1, n_output), -5.0, jnp.float32),
        mask_mean=jnp.asarray(mask_mean0),
        mask_logvar_mul=jnp.ones((n_output, n_in0), jnp.float32),
        mask_logvar_add=jnp.asarray(mask_logvar_add0),
        indices_of_nodes_to_cache=[],
        indices_of_needed_nodes=[(1, 2)],  # (layer_key, input index) in the cache
    )
    return {0: layer0, 1: layer1}


def make_eps(layers, key):
    eps = {}
    for i in sorted(layers.keys(), reverse=True):
        key, kw, kb = jax.random.split(key, 3)
        eps[i] = (jax.random.normal(kw, layers[i]["qw_mean"].shape, jnp.float32),
                  jax.random.normal(kb, layers[i]["qb_mean"].shape, jnp.float32))
    return eps


if __name__ == "__main__":
    key = jax.random.PRNGKey(0)
    pkey, xkey, ekey = jax.random.split(key, 3)

    layers = build_layers(pkey)
    batch, n_input = 2, 4
    x = jax.random.normal(xkey, (batch, n_input), jnp.float32)
    eps = make_eps(layers, ekey)

    forward, pack_eps = build_fused_network(layers, n_input=n_input, batch=batch)
    eps_w_stack, eps_b_stack = pack_eps(eps)

    out, kl = forward(x, eps_w_stack, eps_b_stack)
    out = jax.block_until_ready(out)
    kl = jax.block_until_ready(kl)

    out_ref, kl_ref = ref_network_forward(layers, x, eps)
    np.testing.assert_allclose(np.asarray(out), np.asarray(out_ref),
                               rtol=1e-4, atol=1e-4)
    np.testing.assert_allclose(np.asarray(kl), np.asarray(kl_ref),
                               rtol=1e-5, atol=1e-3)

    print("KERNEL_OK")
</pallas_src>

<mosaic_0001>
module attributes {stable_mosaic.version = 11 : i64} {
  func.func @kernel(%arg0: i32, %arg1: memref<8x128xf32, #tpu.memory_space<vmem>>, %arg2: memref<2x32x128xf32, #tpu.memory_space<vmem>>, %arg3: memref<2x2x128xf32, #tpu.memory_space<vmem>>, %arg4: memref<2x16x128xf32, #tpu.memory_space<vmem>>, %arg5: memref<2x1x128xf32, #tpu.memory_space<vmem>>, %arg6: memref<8x128xf32, #tpu.memory_space<vmem>>) attributes {dimension_semantics = [#tpu.dimension_semantics<parallel>], iteration_bounds = array<i64: 1>, scalar_prefetch = 0 : i64, scratch_operands = 0 : i64, tpu.core_type = #tpu.core_type<tc>, window_params = [{transform_indices = @transform_0, window_bounds = array<i64: 8, 128>}, {pipeline_mode = #tpu.pipeline_mode<synchronous>, transform_indices = @transform_1, window_bounds = array<i64: 2, 32, 128>}, {pipeline_mode = #tpu.pipeline_mode<synchronous>, transform_indices = @transform_2, window_bounds = array<i64: 2, 2, 128>}, {pipeline_mode = #tpu.pipeline_mode<synchronous>, transform_indices = @transform_3, window_bounds = array<i64: 2, 16, 128>}, {pipeline_mode = #tpu.pipeline_mode<synchronous>, transform_indices = @transform_4, window_bounds = array<i64: 2, 1, 128>}, {transform_indices = @transform_5, window_bounds = array<i64: 8, 128>}]} {
    %c0 = arith.constant 0 : index
    %c0_0 = arith.constant 0 : index
    %0 = vector.load %arg1[%c0, %c0_0] : memref<8x128xf32, #tpu.memory_space<vmem>>, vector<8x128xf32>
    %1 = tpu.iota {dimensions = array<i32: 1>} : vector<8x128xi32>
    %2 = vector.extract_strided_slice %0 {offsets = [0, 2], sizes = [8, 1], strides = [1, 1]} : vector<8x128xf32> to vector<8x1xf32>
    %c0_1 = arith.constant 0 : index
    %c0_2 = arith.constant 0 : index
    %c0_3 = arith.constant 0 : index
    %3 = vector.load %arg2[%c0_1, %c0_2, %c0_3] : memref<2x32x128xf32, #tpu.memory_space<vmem>>, vector<1x32x128xf32>
    %4 = vector.shape_cast %3 : vector<1x32x128xf32> to vector<32x128xf32>
    %5 = vector.extract_strided_slice %4 {offsets = [0, 0], sizes = [16, 128], strides = [1, 1]} : vector<32x128xf32> to vector<16x128xf32>
    %6 = vector.extract_strided_slice %4 {offsets = [16, 0], sizes = [16, 128], strides = [1, 1]} : vector<32x128xf32> to vector<16x128xf32>
    %c0_4 = arith.constant 0 : index
    %c0_5 = arith.constant 0 : index
    %c0_6 = arith.constant 0 : index
    %7 = vector.load %arg4[%c0_4, %c0_5, %c0_6] : memref<2x16x128xf32, #tpu.memory_space<vmem>>, vector<1x16x128xf32>
    %8 = vector.shape_cast %7 : vector<1x16x128xf32> to vector<16x128xf32>
    %9 = arith.mulf %6, %8 : vector<16x128xf32>
    %10 = arith.addf %5, %9 : vector<16x128xf32>
    %c0_7 = arith.constant 0 : index
    %c0_8 = arith.constant 0 : index
    %c0_9 = arith.constant 0 : index
    %11 = vector.load %arg3[%c0_7, %c0_8, %c0_9] : memref<2x2x128xf32, #tpu.memory_space<vmem>>, vector<1x2x128xf32>
    %12 = vector.shape_cast %11 : vector<1x2x128xf32> to vector<2x128xf32>
    %13 = vector.extract_strided_slice %12 {offsets = [0, 0], sizes = [1, 128], strides = [1, 1]} : vector<2x128xf32> to vector<1x128xf32>
    %14 = vector.extract_strided_slice %12 {offsets = [1, 0], sizes = [1, 128], strides = [1, 1]} : vector<2x128xf32> to vector<1x128xf32>
    %c0_10 = arith.constant 0 : index
    %c0_11 = arith.constant 0 : index
    %c0_12 = arith.constant 0 : index
    %15 = vector.load %arg5[%c0_10, %c0_11, %c0_12] : memref<2x1x128xf32, #tpu.memory_space<vmem>>, vector<1x1x128xf32>
    %16 = vector.shape_cast %15 : vector<1x1x128xf32> to vector<1x128xf32>
    %17 = arith.mulf %14, %16 : vector<1x128xf32>
    %18 = arith.addf %13, %17 : vector<1x128xf32>
    %19 = vector.extract_strided_slice %0 {offsets = [0, 0], sizes = [8, 16], strides = [1, 1]} : vector<8x128xf32> to vector<8x16xf32>
    %cst = arith.constant dense<0.000000e+00> : vector<8x128xf32>
    %20 = tpu.matmul %19, %10, %cst {dimension_numbers = #tpu.dot_dimension_numbers<[1], [0], [0], [1], [0, 0, 1, 1], [], []>} : vector<8x16xf32>, vector<16x128xf32>, vector<8x128xf32> -> vector<8x128xf32>
    %21 = vector.broadcast %18 : vector<1x128xf32> to vector<8x128xf32>
    %22 = arith.addf %20, %21 : vector<8x128xf32>
    %cst_13 = arith.constant 0.000000e+00 : f32
    %23 = vector.broadcast %cst_13 : f32 to vector<8x128xf32>
    %24 = arith.subf %23, %22 : vector<8x128xf32>
    %25 = math.exp %24 : vector<8x128xf32>
    %cst_14 = arith.constant 1.000000e+00 : f32
    %26 = vector.broadcast %cst_14 : f32 to vector<8x128xf32>
    %27 = arith.addf %26, %25 : vector<8x128xf32>
    %cst_15 = arith.constant 1.000000e+00 : f32
    %28 = vector.broadcast %cst_15 : f32 to vector<8x128xf32>
    %29 = arith.divf %28, %27 : vector<8x128xf32>
    %c8_i32 = arith.constant 8 : i32
    %30 = vector.broadcast %c8_i32 : i32 to vector<8x128xi32>
    %31 = arith.cmpi eq, %1, %30 : vector<8x128xi32>
    %32 = vector.shape_cast %2 : vector<8x1xf32> to vector<8x1xf32>
    %33 = vector.broadcast %32 : vector<8x1xf32> to vector<8x128xf32>
    %34 = arith.select %31, %33, %29 : vector<8x128xi1>, vector<8x128xf32>
    %c1 = arith.constant 1 : index
    %c0_16 = arith.constant 0 : index
    %c0_17 = arith.constant 0 : index
    %35 = vector.load %arg2[%c1, %c0_16, %c0_17] : memref<2x32x128xf32, #tpu.memory_space<vmem>>, vector<1x32x128xf32>
    %36 = vector.shape_cast %35 : vector<1x32x128xf32> to vector<32x128xf32>
    %37 = vector.extract_strided_slice %36 {offsets = [0, 0], sizes = [16, 128], strides = [1, 1]} : vector<32x128xf32> to vector<16x128xf32>
    %38 = vector.extract_strided_slice %36 {offsets = [16, 0], sizes = [16, 128], strides = [1, 1]} : vector<32x128xf32> to vector<16x128xf32>
    %c1_18 = arith.constant 1 : index
    %c0_19 = arith.constant 0 : index
    %c0_20 = arith.constant 0 : index
    %39 = vector.load %arg4[%c1_18, %c0_19, %c0_20] : memref<2x16x128xf32, #tpu.memory_space<vmem>>, vector<1x16x128xf32>
    %40 = vector.shape_cast %39 : vector<1x16x128xf32> to vector<16x128xf32>
    %41 = arith.mulf %38, %40 : vector<16x128xf32>
    %42 = arith.addf %37, %41 : vector<16x128xf32>
    %c1_21 = arith.constant 1 : index
    %c0_22 = arith.constant 0 : index
    %c0_23 = arith.constant 0 : index
    %43 = vector.load %arg3[%c1_21, %c0_22, %c0_23] : memref<2x2x128xf32, #tpu.memory_space<vmem>>, vector<1x2x128xf32>
    %44 = vector.shape_cast %43 : vector<1x2x128xf32> to vector<2x128xf32>
    %45 = vector.extract_strided_slice %44 {offsets = [0, 0], sizes = [1, 128], strides = [1, 1]} : vector<2x128xf32> to vector<1x128xf32>
    %46 = vector.extract_strided_slice %44 {offsets = [1, 0], sizes = [1, 128], strides = [1, 1]} : vector<2x128xf32> to vector<1x128xf32>
    %c1_24 = arith.constant 1 : index
    %c0_25 = arith.constant 0 : index
    %c0_26 = arith.constant 0 : index
    %47 = vector.load %arg5[%c1_24, %c0_25, %c0_26] : memref<2x1x128xf32, #tpu.memory_space<vmem>>, vector<1x1x128xf32>
    %48 = vector.shape_cast %47 : vector<1x1x128xf32> to vector<1x128xf32>
    %49 = arith.mulf %46, %48 : vector<1x128xf32>
    %50 = arith.addf %45, %49 : vector<1x128xf32>
    %51 = vector.extract_strided_slice %34 {offsets = [0, 0], sizes = [8, 16], strides = [1, 1]} : vector<8x128xf32> to vector<8x16xf32>
    %cst_27 = arith.constant dense<0.000000e+00> : vector<8x128xf32>
    %52 = tpu.matmul %51, %42, %cst_27 {dimension_numbers = #tpu.dot_dimension_numbers<[1], [0], [0], [1], [0, 0, 1, 1], [], []>} : vector<8x16xf32>, vector<16x128xf32>, vector<8x128xf32> -> vector<8x128xf32>
    %53 = vector.broadcast %50 : vector<1x128xf32> to vector<8x128xf32>
    %54 = arith.addf %52, %53 : vector<8x128xf32>
    %c0_28 = arith.constant 0 : index
    %c0_29 = arith.constant 0 : index
    %55 = vector.load %arg6[%c0_28, %c0_29] : memref<8x128xf32, #tpu.memory_space<vmem>>, vector<8x128xf32>
    tpu.vector_store %arg6[%c0_28, %c0_29], %54 {strides = array<i32>} : memref<8x128xf32, #tpu.memory_space<vmem>>, vector<8x128xf32>,
    return
  }
  func.func @transform_0(%arg0: i32) -> (i32, i32) {
    %c0_i32 = arith.constant 0 : i32
    %c0_i32_0 = arith.constant 0 : i32
    return %arg0, %c0_i32 : i32, i32
  }
  func.func @transform_1(%arg0: i32) -> (i32, i32, i32) {
    %c0_i32 = arith.constant 0 : i32
    %c0_i32_0 = arith.constant 0 : i32
    %c0_i32_1 = arith.constant 0 : i32
    %c0_i32_2 = arith.constant 0 : i32
    return %c0_i32, %c0_i32_0, %c0_i32_1 : i32, i32, i32
  }
  func.func @transform_2(%arg0: i32) -> (i32, i32, i32) {
    %c0_i32 = arith.constant 0 : i32
    %c0_i32_0 = arith.constant 0 : i32
    %c0_i32_1 = arith.constant 0 : i32
    %c0_i32_2 = arith.constant 0 : i32
    return %c0_i32, %c0_i32_0, %c0_i32_1 : i32, i32, i32
  }
  func.func @transform_3(%arg0: i32) -> (i32, i32, i32) {
    %c0_i32 = arith.constant 0 : i32
    %c0_i32_0 = arith.constant 0 : i32
    %c0_i32_1 = arith.constant 0 : i32
    %c0_i32_2 = arith.constant 0 : i32
    return %c0_i32, %c0_i32_0, %c0_i32_1 : i32, i32, i32
  }
  func.func @transform_4(%arg0: i32) -> (i32, i32, i32) {
    %c0_i32 = arith.constant 0 : i32
    %c0_i32_0 = arith.constant 0 : i32
    %c0_i32_1 = arith.constant 0 : i32
    %c0_i32_2 = arith.constant 0 : i32
    return %c0_i32, %c0_i32_0, %c0_i32_1 : i32, i32, i32
  }
  func.func @transform_5(%arg0: i32) -> (i32, i32) {
    %c0_i32 = arith.constant 0 : i32
    %c0_i32_0 = arith.constant 0 : i32
    return %arg0, %c0_i32 : i32, i32
  }
}

</mosaic_0001>

<bundles_post_ra>
// kernel: forward.1
= control target key start
LH: loop header
LB: loop body
LE: loop exit
PB: predicated region body
PF: predicated region fallthrough
CT: control target
= control target key end

     0   :  { %10 = vsyncpa [#allocation3], 0  ;;  %s450_s0 = inlined_call_operand.vmem [shape: f32[8,128], index: 0, kind: input, shape index: {}]   ;;  %s451_s1 = inlined_call_operand.hbm [shape: f32[2,32,128], index: 1, kind: input, shape index: {}]   ;;  %s452_s2 = inlined_call_operand.vmem [shape: f32[2,2,128], index: 2, kind: input, shape index: {}]   ;;  %s453_s3 = inlined_call_operand.hbm [shape: f32[2,16,128], index: 3, kind: input, shape index: {}]   ;;  %s454_s4 = inlined_call_operand.vmem [shape: f32[2,1,128], index: 4, kind: input, shape index: {}]   ;;  %s455_s5 = inlined_call_operand.vmem [shape: f32[8,128], index: 5, kind: output, shape index: {}]  }
   0x1   :  { %11 = vsyncpa [#allocation5], 0  ;;  %s368_s18 = smov [#allocation2]   ;;  %s320_s22 = scalar_lea.hbm %s451_s1, 1024 }
   0x2   :  { %s19_s19 = sshll.u32 %s368_s18, 4  ;;  %p321_p0 = scmp.ne.s32.totalorder %s451_s1, %s320_s22  ;;  %s20_s19 = int_to_ptr.vmem [resolvable:$true] %s19_s19 }
   0x3   :  { %p324_p1 = scmp.lt.u32.totalorder %s320_s22, %s451_s1 }
   0x5   :  { %p326_p2 = pnand %p324_p1, %p321_p0 }
   0x7   :  { %329 = shalt.err (!%p326_p2)
}
   0x8   :  { %s330_s27 = scalar_lea.vmem %s20_s19, 1024  ;;  %p335_p4 = scmp.lt.s32.totalorder %s20_s19, %s20_s19 }
   0x9   :  { %p331_p3 = scmp.ne.s32.totalorder %s20_s19, %s330_s27  ;;  %p336_p5 = scmp.lt.s32.totalorder %s330_s27, %s330_s27 }
   0xb   :  { %p337_p6 = por %p336_p5, %p335_p4 }
   0xd   :  { %p338_p7 = pnand %p337_p6, %p331_p3 }
   0xf   :  { %341 = shalt.err (!%p338_p7)
}
  0x10   :  { %s369_s28 = smov 128   ;;  %s370_s29 = smov 8  }
  0x11   :  { %25 = dma.hbm_to_vmem [thread:$0]  %s451_s1, 1024, %s20_s19, [#allocation3], %s369_s28, %s369_s28, %s370_s29  }
  0x12   :  { %s371_s7 = smov [#allocation4]   ;;  %s342_s11 = scalar_lea.hbm %s453_s3, 512 }
  0x13   :  { %s33_s8 = sshll.u32 %s371_s7, 4  ;;  %p343_p8 = scmp.ne.s32.totalorder %s453_s3, %s342_s11  ;;  %s34_s8 = int_to_ptr.vmem [resolvable:$true] %s33_s8 }
  0x14   :  { %p346_p9 = scmp.lt.u32.totalorder %s342_s11, %s453_s3 }
  0x16   :  { %p348_p10 = pnand %p346_p9, %p343_p8 }
  0x18   :  { %351 = shalt.err (!%p348_p10)
}
  0x19   :  { %s352_s16 = scalar_lea.vmem %s34_s8, 512  ;;  %p357_p12 = scmp.lt.s32.totalorder %s34_s8, %s34_s8 }
  0x1a   :  { %p353_p11 = scmp.ne.s32.totalorder %s34_s8, %s352_s16  ;;  %p358_p13 = scmp.lt.s32.totalorder %s352_s16, %s352_s16 }
  0x1c   :  { %p359_p0 = por %p358_p13, %p357_p12 }
  0x1e   :  { %p360_p1 = pnand %p359_p0, %p353_p11 }
  0x20   :  { %363 = shalt.err (!%p360_p1)
}
  0x21   :  { %39 = dma.hbm_to_vmem [thread:$0]  %s453_s3, 512, %s34_s8, [#allocation5], %s369_s28, %s369_s28, %s370_s29  }
  0x22   :  { %364 = dma.done.wait [#allocation3], 1024  }
  0x23   :  { %365 = vsyncadd [#allocation3], 4294966272 }
  0x24   :  { %366 = dma.done.wait [#allocation5], 512  }
  0x25   :  { %367 = vsyncadd [#allocation5], 4294966784  ;;  %v372_v0 = vmov 0.0|0.0   ;;  %vm373_vm0 = vmmov 0   ;;  %v374_v1 = vmov 0.0   ;;  %v375_v2 = vmov 2  }
  0x26   :  { %301 = vmatprep.subr.bf16.mxu0 %v372_v0  ;;  %291 = vmatprep.mubr.msk.f32.mxu0 %vm373_vm0, %v374_v1  ;;  %v51_v3 = vld [vmem:[#allocation2] sm:$0xff]  ;;  %v52_v4 = vld [vmem:[#allocation2 + $0x8] sm:$0xff]  ;;  %v53_v5 = vld [vmem:[#allocation2 + $0x10] sm:$0xff]  ;;  %vm78_vm1 = vcmask 130048   ;;  %v49_v28 = vlaneseq }
  0x27   :  { %315 = vset.pattern.permute.xlu0 %v375_v2  ;;  %304 = vmatprep.subr.bf16.mxu1 %v372_v0  ;;  %v54_v6 = vld [vmem:[#allocation2 + $0x18] sm:$0xff]  ;;  %v55_v7 = vld [vmem:[#allocation4] sm:$0xff]  ;;  %v56_v8 = vld [vmem:[#allocation4 + $0x8] sm:$0xff] }
  0x28   :  { %298 = vmatprep.mubr.msk.f32.mxu1 %vm373_vm0, %v374_v1  ;;  %v57_v9 = vmul.f32 %v55_v7, %v53_v5  ;;  %v58_v10 = vmul.f32 %v56_v8, %v54_v6  ;;  %v48_v11 = vld [vmem:[%s450_s0] sm:$0xff]  ;;  %v166_v16 = vld [vmem:[#allocation2 + $0x28] sm:$0xff]  ;;  %v167_v17 = vld [vmem:[#allocation2 + $0x30] sm:$0xff]  ;;  %v75_v31 = vshrl.u32 %v49_v28, 7  ;;  %v50_v42 = vand.u32 127, %v49_v28 }
  0x29   :  { %160 = vperm.xlu0 %315, %v48_v11   ;;  %v165_v15 = vld [vmem:[#allocation2 + $0x20] sm:$0xff]  ;;  %v168_v18 = vld [vmem:[#allocation2 + $0x38] sm:$0xff]  ;;  %v170_v19 = vld [vmem:[#allocation4 + $0x10] sm:$0xff] }
  0x2a   :  { %v59_v12 = vadd.f32 %v57_v9, %v51_v3  ;;  %v60_v13 = vadd.f32 %v58_v10, %v52_v4  ;;  %v171_v20 = vld [vmem:[#allocation4 + $0x18] sm:$0xff]  ;;  %v172_v21 = vmul.f32 %v170_v19, %v167_v17  ;;  %v61_v26 = vld [vmem:[%s452_s2] sm:$0x3]  ;;  %v76_v33 = vsub.s32 0, %v75_v31  ;;  %v277_v46 = vld [vmem:[%s452_s2 + $0x2] sm:$0x3] }
  0x2b   :  { %v173_v22 = vmul.f32 %v171_v20, %v168_v18  ;;  %v275_v27 = vld [vmem:[%s454_s4] ss:$0 sm:$0xff]  ;;  %vm158_vm2 = vcmp.eq.s32.totalorder %v50_v42, 8  ;;  %v279_v47 = vld [vmem:[%s454_s4 + $0x1] ss:$0 sm:$0xff] }
  0x2c   :  { %v302_v14 = vpack.c.bf16 %v60_v13, %v59_v12  ;;  %v174_v23 = vadd.f32 %v172_v21, %v165_v15  ;;  %v69_v29 = vmul.f32 %v275_v27, %v61_v26  ;;  %v186_v48 = vmul.f32 %v279_v47, %v277_v46 }
  0x2d   :  { %v175_v24 = vadd.f32 %v173_v22, %v166_v16 }
  0x2e   :  { %303 = vmatpush3.bf16.msra.mxu0 %v302_v14  ;;  %v71_v30 = vrot.slane %v69_v29, 1  ;;  %v188_v49 = vrot.slane %v186_v48, 1 }
  0x2f   :  { %v305_v25 = vpack.c.bf16 %v175_v24, %v174_v23 }
  0x30   :  { %v73_v32 = vadd.f32 %v71_v30, %v61_v26  ;;  %v190_v50 = vadd.f32 %v277_v46, %v188_v49 }
  0x31   :  { %292 = vmatmul.mubr.msk.f32.vlgmr.msra.gmra.mrb[0].mxu0 %vm78_vm1, %v48_v11  ;;  %306 = vmatpush3.bf16.msra.mxu1 %v305_v25 }
  0x32   :  { %v77_v34 = vrot.slane %v73_v32, %v76_v33  ;;  %v194_v51 = vrot.slane %v190_v50, %v76_v33 }
  0xa8   :  { %v161_v43 = vpop.permute.xlu0 %160 }
 0x104   :  { %v148_v35 = vpop.f32.mrb[0].mxu0 }
 0x105   :  { %v149_v36 = vadd.f32 %v148_v35, %v77_v34  ;;  %v293_v37 = vpop.f32.mrb[1].mxu0 }
 0x107   :  { %v152_v38 = vsub.f32 0.0, %v149_v36 }
 0x109   :  { %v153_v39 = vmul.f32 1.442695, %v152_v38 }
 0x10b   :  { %316 = vpow2.f32 %v153_v39 }
 0x115   :  { %v317_v40 = vpop.eup %316 }
 0x116   :  { %v155_v41 = vadd.f32 1.0, %v317_v40 }
 0x118   :  { %318 = vrcp.f32 %v155_v41 }
 0x122   :  { %v319_v44 = vpop.eup %318 }
 0x123   :  { %v163_v45 = vsel %vm158_vm2, %v161_v43, %v319_v44 }
 0x124   :  { %299 = vmatmul.mubr.msk.f32.vlgmr.msra.gmra.mrb[0].mxu1 %vm78_vm1, %v163_v45 }
 0x1f7   :  { %v264_v52 = vpop.f32.mrb[0].mxu1 }
 0x1f8   :  { %v265_v53 = vadd.f32 %v264_v52, %v194_v51  ;;  %v300_v54 = vpop.f32.mrb[1].mxu1 }
 0x1fa   :  { %268 = vst [vmem:[%s455_s5] sm:$0xff] %v265_v53 }
 0x1fb   :  { %273 = vsyncpa [#allocation3], 1 }
 0x1fc   :  { %274 = vsyncpa [#allocation5], 1 }

</bundles_post_ra>
